<compile_context>
chip_gen: v6e
topology: v6e:2x2x1
jax: 0.10.0
libtpu: 0.0.40
codegen_flags: <defaults>
</compile_context>

<pallas_src>
import math

import jax
import jax.numpy as jnp
from jax.experimental import pallas as pl
from jax.experimental.pallas import tpu as pltpu


_LANE = 128                          # lane width; output / fused-N padding granularity
_VMEM_LIMIT = 48 * 1024 * 1024       # scoped VMEM limit requested (fits v5e/v6e/v7x)
_TILE_BUDGET = 32 * 1024 * 1024      # portion of the limit the streamed tiles may use
_MAX_ROWS = 2048                     # cap on rows (TB*TS) per grid step


def _round_up(x, m):
    return (x + m - 1) // m * m


def _learn_gate_kernel(x_ref, hvb_ref, u_ref, o_ref):
    """One (batch-tile, seq-tile) block of the learn gate.

    x_ref:   (TB, TS, in_dims)    streamed activations (native dtype)
    hvb_ref: (TB, 1, 2*hid_p)     per-batch hoisted bias [h@V1+B1 | h@V2+B2], f32
    u_ref:   (in_dims, 2*hid_p)   fused, lane-padded gate weights [U1 | U2]
    o_ref:   (TB, TS, hid_p)
    """
    hid_p = o_ref.shape[-1]
    x = x_ref[...]
    u = u_ref[...]
    if x.dtype != u.dtype:
        # In-kernel cast of VMEM-resident data (VPU); avoids a standalone
        # HBM-level cast pass of the large x stream in the wrapper.
        x = x.astype(u.dtype)

    # Single fused wide-N MXU matmul with f32 accumulation:
    #   (TB, TS, in_dims) x (in_dims, 2*hid_p) -> (TB, TS, 2*hid_p)
    pre = jax.lax.dot_general(
        x, u, (((2,), (0,)), ((), ())),
        preferred_element_type=jnp.float32)
    pre = pre + hvb_ref[...]            # broadcast over the TS axis (f32)

    z_i = pre[..., :hid_p]              # tile-aligned split (hid_p % 128 == 0)
    z_n = pre[..., hid_p:]
    # sigmoid(z) == 0.5 * tanh(0.5 * z) + 0.5  -> one EUP transcendental per gate.
    i_t = 0.5 * jnp.tanh(0.5 * z_i) + 0.5
    n_t = jnp.tanh(z_n)
    o_ref[...] = (n_t * i_t).astype(o_ref.dtype)


def _pick_tiles(b, s, in_dims, hid_p, x_isz, o_isz, u_bytes, row_align,
                max_rows_cap=_MAX_ROWS, tile_budget=_TILE_BUDGET):
    """Derive (TB, TS) row tiling from a VMEM byte budget (cdiv grid; no
    divisibility requirement on seq)."""
    per_row = (
        2 * in_dims * x_isz        # x tile, double-buffered
        + 2 * hid_p * o_isz        # out tile, double-buffered
        + 4 * hid_p * 4            # f32 intermediates (fused pre, gate values)
    )
    # Fused weights stay resident (default double-buffering accounted for).
    # TODO(synk): if 2*u_bytes ever exceeds the budget (huge in_dims*hid), add a
    # grid axis over N and tile u instead of keeping it fully resident.
    avail = tile_budget - 2 * u_bytes
    max_rows = max(avail // per_row, row_align)
    max_rows = int(min(max_rows, max_rows_cap))

    if max_rows >= s:
        ts = s                                   # full seq per step
        tb = max(1, min(b, max_rows // max(s, 1)))
        while b % tb:                            # keep the batch grid exact
            tb -= 1
    else:
        # Seq tiling with a ragged (masked) last tile; TS sublane-aligned.
        ts = max((max_rows // row_align) * row_align, row_align)
        tb = 1
    return tb, ts


def learn_gate(inp, h_t, U1, V1, B1, U2, V2, B2, *,
               weight_dtype=None, out_dtype=None, _test_max_rows=None):
    """L_T = tanh(x@U2 + h@V2 + B2) * sigmoid(x@U1 + h@V1 + B1), all timesteps.

    Returns (batch, seq, hid_dims).  `weight_dtype` (e.g. jnp.bfloat16) casts only
    the fused gate weights for the MXU; `out_dtype` selects the output stream
    dtype (defaults to inp.dtype).  All accumulation / elementwise math is f32.
    """
    b, s, in_dims = inp.shape
    hid = U1.shape[1]
    out_dtype = inp.dtype if out_dtype is None else out_dtype

    # Lane-dense padding: hid -> multiple of 128 so output stores are unmasked
    # and the fused N (= 2*hid_p) is a multiple of 256.
    hid_p = _round_up(hid, _LANE)
    pad = hid_p - hid

    def pad_cols(w):
        return jnp.pad(w, ((0, 0), (0, pad))) if pad else w

    # Hoist the h-dependent terms (constant across timesteps) -> per-batch bias.
    hv1 = pad_cols((h_t @ V1 + B1).astype(jnp.float32))          # (b, hid_p)
    hv2 = pad_cols((h_t @ V2 + B2).astype(jnp.float32))          # (b, hid_p)
    hvb = jnp.concatenate([hv1, hv2], axis=-1).reshape(b, 1, 2 * hid_p)

    # Fuse the two gate weight matrices into one wide-N MXU operand.
    u = jnp.concatenate([pad_cols(U1), pad_cols(U2)], axis=-1)   # (in_dims, 2*hid_p)
    if weight_dtype is not None:
        u = u.astype(weight_dtype)          # weights only; x is NOT cast in HBM

    x_isz = jnp.dtype(inp.dtype).itemsize
    o_isz = jnp.dtype(out_dtype).itemsize
    u_bytes = u.size * jnp.dtype(u.dtype).itemsize
    row_align = 32 // min(x_isz, o_isz)     # 8 for f32 rows, 16 for bf16 rows

    tb, ts = _pick_tiles(
        b, s, in_dims, hid_p, x_isz, o_isz, u_bytes, row_align,
        max_rows_cap=_MAX_ROWS if _test_max_rows is None else _test_max_rows)
    grid = (pl.cdiv(b, tb), pl.cdiv(s, ts))

    cost = pl.CostEstimate(
        flops=2 * b * s * in_dims * (2 * hid_p),
        transcendentals=2 * b * s * hid_p,
        bytes_accessed=(inp.size * x_isz + u_bytes + hvb.size * 4
                        + b * s * hid_p * o_isz),
    )

    out = pl.pallas_call(
        _learn_gate_kernel,
        out_shape=jax.ShapeDtypeStruct((b, s, hid_p), out_dtype),
        grid=grid,
        in_specs=[
            pl.BlockSpec((tb, ts, in_dims), lambda bi, si: (bi, si, 0)),   # x tile
            pl.BlockSpec((tb, 1, 2 * hid_p), lambda bi, si: (bi, 0, 0)),   # per-batch hvb
            pl.BlockSpec((in_dims, 2 * hid_p), lambda bi, si: (0, 0)),     # fused weights
        ],
        out_specs=pl.BlockSpec((tb, ts, hid_p), lambda bi, si: (bi, si, 0)),
        compiler_params=pltpu.CompilerParams(
            dimension_semantics=("parallel", "parallel"),
            vmem_limit_bytes=_VMEM_LIMIT),
        cost_estimate=cost,
    )(inp, hvb, u)

    return out[..., :hid] if pad else out


def _reference(inp, h_t, U1, V1, B1, U2, V2, B2):
    """Pure-JAX reference matching the PyTorch loop semantics."""
    outs = []
    for i in range(inp.shape[1]):
        x_t = inp[:, i, :]
        i_t = jax.nn.sigmoid(x_t @ U1 + h_t @ V1 + B1)
        n_t = jnp.tanh(x_t @ U2 + h_t @ V2 + B2)
        outs.append(n_t * i_t)
    return jnp.stack(outs, axis=1)


if __name__ == "__main__":
    batch, seq, in_dims, hid_dims = 2, 8, 16, 32

    key = jax.random.PRNGKey(0)
    (k_inp, k_h, k_u1, k_v1, k_b1, k_u2, k_v2, k_b2,
     k_inp2, k_h2) = jax.random.split(key, 10)

    # Parameter init mimicking init_weights: uniform(-stdv, stdv), stdv=1/sqrt(hid).
    stdv = 1.0 / math.sqrt(hid_dims)
    uni = lambda k, shape: jax.random.uniform(
        k, shape, dtype=jnp.float32, minval=-stdv, maxval=stdv)

    U1 = uni(k_u1, (in_dims, hid_dims))
    V1 = uni(k_v1, (hid_dims, hid_dims))
    B1 = uni(k_b1, (hid_dims,))
    U2 = uni(k_u2, (in_dims, hid_dims))
    V2 = uni(k_v2, (hid_dims, hid_dims))
    B2 = uni(k_b2, (hid_dims,))

    inp = jax.random.normal(k_inp, (batch, seq, in_dims), dtype=jnp.float32)

    # Case 1: mem is None in the reference -> h_t = zeros.
    h_zero = jnp.zeros((batch, hid_dims), dtype=jnp.float32)
    out = jax.block_until_ready(learn_gate(inp, h_zero, U1, V1, B1, U2, V2, B2))
    ref = _reference(inp, h_zero, U1, V1, B1, U2, V2, B2)
    assert out.shape == (batch, seq, hid_dims)
    assert jnp.allclose(out, ref, atol=1e-5, rtol=1e-5), "mismatch (h=0, f32)"

    # Case 2: non-zero h_t exercises the hoisted h@V + B bias path.
    h_rand = jax.random.normal(k_h, (batch, hid_dims), dtype=jnp.float32)
    out2 = jax.block_until_ready(learn_gate(inp, h_rand, U1, V1, B1, U2, V2, B2))
    ref2 = _reference(inp, h_rand, U1, V1, B1, U2, V2, B2)
    assert jnp.allclose(out2, ref2, atol=1e-5, rtol=1e-5), "mismatch (h!=0, f32)"

    # Case 3: bf16 weights on the MXU (x stays f32 in HBM; f32 accum/elementwise).
    out_bw = jax.block_until_ready(
        learn_gate(inp, h_rand, U1, V1, B1, U2, V2, B2,
                   weight_dtype=jnp.bfloat16))
    assert jnp.allclose(out_bw, ref2, atol=2e-2, rtol=2e-2), "mismatch (bf16 W)"

    # Case 4: bf16 output stream (halves write bytes when downstream tolerates it).
    out_bo = jax.block_until_ready(
        learn_gate(inp, h_rand, U1, V1, B1, U2, V2, B2,
                   out_dtype=jnp.bfloat16)).astype(jnp.float32)
    assert jnp.allclose(out_bo, ref2, atol=1e-2, rtol=1e-2), "mismatch (bf16 out)"

    # Case 5: awkward (batch, seq) with a capped row budget -> exercises the
    # cdiv grid with a ragged (masked) last seq tile.
    b2, s2 = 3, 11
    inp_r = jax.random.normal(k_inp2, (b2, s2, in_dims), dtype=jnp.float32)
    h_r = jax.random.normal(k_h2, (b2, hid_dims), dtype=jnp.float32)
    out_r = jax.block_until_ready(
        learn_gate(inp_r, h_r, U1, V1, B1, U2, V2, B2, _test_max_rows=8))
    ref_r = _reference(inp_r, h_r, U1, V1, B1, U2, V2, B2)
    assert out_r.shape == (b2, s2, hid_dims)
    assert jnp.allclose(out_r, ref_r, atol=1e-5, rtol=1e-5), "mismatch (ragged)"

    print("KERNEL_OK")
</pallas_src>

<mosaic_0001>
module attributes {stable_mosaic.version = 11 : i64} {
  func.func @_learn_gate_kernel(%arg0: i32, %arg1: i32, %arg2: memref<2x8x16xf32, #tpu.memory_space<vmem>>, %arg3: memref<2x1x256xf32, #tpu.memory_space<vmem>>, %arg4: memref<16x256xf32, #tpu.memory_space<vmem>>, %arg5: memref<2x8x128xf32, #tpu.memory_space<vmem>>) attributes {dimension_semantics = [#tpu.dimension_semantics<parallel>, #tpu.dimension_semantics<parallel>], iteration_bounds = array<i64: 1, 1>, scalar_prefetch = 0 : i64, scratch_operands = 0 : i64, tpu.core_type = #tpu.core_type<tc>, window_params = [{transform_indices = @transform_0, window_bounds = array<i64: 2, 8, 16>}, {transform_indices = @transform_1, window_bounds = array<i64: 2, 1, 256>}, {pipeline_mode = #tpu.pipeline_mode<synchronous>, transform_indices = @transform_2, window_bounds = array<i64: 16, 256>}, {transform_indices = @transform_3, window_bounds = array<i64: 2, 8, 128>}]} {
    %c0 = arith.constant 0 : index
    %c0_0 = arith.constant 0 : index
    %c0_1 = arith.constant 0 : index
    %0 = vector.load %arg2[%c0, %c0_0, %c0_1] : memref<2x8x16xf32, #tpu.memory_space<vmem>>, vector<2x8x16xf32>
    %c0_2 = arith.constant 0 : index
    %c0_3 = arith.constant 0 : index
    %1 = vector.load %arg4[%c0_2, %c0_3] : memref<16x256xf32, #tpu.memory_space<vmem>>, vector<16x256xf32>
    %cst = arith.constant dense<0.000000e+00> : vector<2x8x256xf32>
    %2 = tpu.matmul %0, %1, %cst {dimension_numbers = #tpu.dot_dimension_numbers<[2], [0], [0, 1], [1], [0, 0, 0, 1, 1, 1], [], []>} : vector<2x8x16xf32>, vector<16x256xf32>, vector<2x8x256xf32> -> vector<2x8x256xf32>
    %c0_4 = arith.constant 0 : index
    %c0_5 = arith.constant 0 : index
    %c0_6 = arith.constant 0 : index
    %3 = vector.load %arg3[%c0_4, %c0_5, %c0_6] : memref<2x1x256xf32, #tpu.memory_space<vmem>>, vector<2x1x256xf32>
    %4 = vector.broadcast %3 : vector<2x1x256xf32> to vector<2x8x256xf32>
    %5 = arith.addf %2, %4 : vector<2x8x256xf32>
    %6 = vector.extract_strided_slice %5 {offsets = [0, 0, 0], sizes = [2, 8, 128], strides = [1, 1, 1]} : vector<2x8x256xf32> to vector<2x8x128xf32>
    %7 = vector.extract_strided_slice %5 {offsets = [0, 0, 128], sizes = [2, 8, 128], strides = [1, 1, 1]} : vector<2x8x256xf32> to vector<2x8x128xf32>
    %cst_7 = arith.constant 5.000000e-01 : f32
    %8 = vector.broadcast %cst_7 : f32 to vector<2x8x128xf32>
    %9 = arith.mulf %8, %6 : vector<2x8x128xf32>
    %10 = math.tanh %9 : vector<2x8x128xf32>
    %cst_8 = arith.constant 5.000000e-01 : f32
    %11 = vector.broadcast %cst_8 : f32 to vector<2x8x128xf32>
    %12 = arith.mulf %11, %10 : vector<2x8x128xf32>
    %cst_9 = arith.constant 5.000000e-01 : f32
    %13 = vector.broadcast %cst_9 : f32 to vector<2x8x128xf32>
    %14 = arith.addf %12, %13 : vector<2x8x128xf32>
    %15 = math.tanh %7 : vector<2x8x128xf32>
    %16 = arith.mulf %15, %14 : vector<2x8x128xf32>
    %c0_10 = arith.constant 0 : index
    %c0_11 = arith.constant 0 : index
    %c0_12 = arith.constant 0 : index
    %17 = vector.load %arg5[%c0_10, %c0_11, %c0_12] : memref<2x8x128xf32, #tpu.memory_space<vmem>>, vector<2x8x128xf32>
    tpu.vector_store %arg5[%c0_10, %c0_11, %c0_12], %16 {strides = array<i32>} : memref<2x8x128xf32, #tpu.memory_space<vmem>>, vector<2x8x128xf32>,
    return
  }
  func.func @transform_0(%arg0: i32, %arg1: i32) -> (i32, i32, i32) {
    %c0_i32 = arith.constant 0 : i32
    %c0_i32_0 = arith.constant 0 : i32
    return %arg0, %arg1, %c0_i32 : i32, i32, i32
  }
  func.func @transform_1(%arg0: i32, %arg1: i32) -> (i32, i32, i32) {
    %c0_i32 = arith.constant 0 : i32
    %c0_i32_0 = arith.constant 0 : i32
    %c0_i32_1 = arith.constant 0 : i32
    return %arg0, %c0_i32, %c0_i32_0 : i32, i32, i32
  }
  func.func @transform_2(%arg0: i32, %arg1: i32) -> (i32, i32) {
    %c0_i32 = arith.constant 0 : i32
    %c0_i32_0 = arith.constant 0 : i32
    %c0_i32_1 = arith.constant 0 : i32
    return %c0_i32, %c0_i32_0 : i32, i32
  }
  func.func @transform_3(%arg0: i32, %arg1: i32) -> (i32, i32, i32) {
    %c0_i32 = arith.constant 0 : i32
    %c0_i32_0 = arith.constant 0 : i32
    return %arg0, %arg1, %c0_i32 : i32, i32, i32
  }
}

</mosaic_0001>

<bundles_post_ra>
// kernel: tpu_custom_call.1
= control target key start
LH: loop header
LB: loop body
LE: loop exit
PB: predicated region body
PF: predicated region fallthrough
CT: control target
= control target key end

     0   :  { %8 = vsyncpa [#allocation3], 0  ;;  %s362_s0 = inlined_call_operand.hbm [shape: f32[2,8,16], index: 0, kind: input, shape index: {}]   ;;  %s363_s1 = inlined_call_operand.hbm [shape: f32[2,1,256], index: 1, kind: input, shape index: {}]   ;;  %s364_s2 = inlined_call_operand.hbm [shape: f32[16,256], index: 2, kind: input, shape index: {}]   ;;  %s365_s3 = inlined_call_operand.hbm [shape: f32[2,8,128], index: 3, kind: output, shape index: {}]  }
   0x1   :  { %9 = vsyncpa [#allocation6], 0 }
   0x2   :  { %10 = vsyncpa [#allocation4], 0  ;;  %s313_s12 = smov [#allocation5]  }
   0x3   :  { %s28_s13 = sshll.u32 %s313_s12, 4  ;;  %s29_s13 = int_to_ptr.vmem [resolvable:$true] %s28_s13 }
   0x4   :  { %s235_s14 = scalar_lea.vmem %s29_s13, 64  ;;  %p240_p1 = scmp.lt.s32.totalorder %s29_s13, %s29_s13 }
   0x5   :  { %p236_p0 = scmp.ne.s32.totalorder %s29_s13, %s235_s14  ;;  %p241_p2 = scmp.lt.s32.totalorder %s235_s14, %s235_s14 }
   0x7   :  { %p242_p3 = por %p241_p2, %p240_p1 }
   0x9   :  { %p243_p4 = pnand %p242_p3, %p236_p0 }
   0xb   :  { %246 = shalt.err (!%p243_p4)
}
   0xc   :  { %s314_s15 = smov 32   ;;  %s315_s16 = smov 2  }
   0xd   :  { %34 = dma.hbm_to_vmem [thread:$0]  %s363_s1, 64, %s29_s13, [#allocation6], %s314_s15, %s314_s15, %s315_s16  }
   0xe   :  { %s316_s19 = smov [#allocation2]  }
   0xf   :  { %s16_s20 = sshll.u32 %s316_s19, 4  ;;  %s17_s20 = int_to_ptr.vmem [resolvable:$true] %s16_s20 }
  0x10   :  { %s255_s21 = scalar_lea.vmem %s17_s20, 256  ;;  %p260_p6 = scmp.lt.s32.totalorder %s17_s20, %s17_s20 }
  0x11   :  { %p256_p5 = scmp.ne.s32.totalorder %s17_s20, %s255_s21  ;;  %p261_p7 = scmp.lt.s32.totalorder %s255_s21, %s255_s21 }
  0x13   :  { %p262_p8 = por %p261_p7, %p260_p6 }
  0x15   :  { %p263_p9 = pnand %p262_p8, %p256_p5 }
  0x17   :  { %266 = shalt.err (!%p263_p9)
}
  0x18   :  { %s317_s22 = smov 128   ;;  %s318_s23 = smov 8  }
  0x19   :  { %22 = dma.hbm_to_vmem [thread:$0]  %s362_s0, 256, %s17_s20, [#allocation3], %s317_s22, %s317_s22, %s318_s23  }
  0x1a   :  { %s319_s1 = smov [#allocation7]  }
  0x1b   :  { %s40_s26 = sshll.u32 %s319_s1, 4  ;;  %s41_s26 = int_to_ptr.vmem [resolvable:$true] %s40_s26 }
  0x1c   :  { %s275_s27 = scalar_lea.vmem %s41_s26, 512  ;;  %p280_p11 = scmp.lt.s32.totalorder %s41_s26, %s41_s26 }
  0x1d   :  { %p276_p10 = scmp.ne.s32.totalorder %s41_s26, %s275_s27  ;;  %p281_p12 = scmp.lt.s32.totalorder %s275_s27, %s275_s27 }
  0x1f   :  { %p282_p13 = por %p281_p12, %p280_p11 }
  0x21   :  { %p283_p0 = pnand %p282_p13, %p276_p10 }
  0x23   :  { %286 = shalt.err (!%p283_p0)
}
  0x24   :  { %s320_s28 = smov 256   ;;  %s321_s29 = smov 16  }
  0x25   :  { %46 = dma.hbm_to_vmem [thread:$0]  %s364_s2, 512, %s41_s26, [#allocation6], %s320_s28, %s320_s28, %s321_s29  }
  0x26   :  { %307 = dma.done.wait [#allocation3], 256  }
  0x27   :  { %308 = vsyncadd [#allocation3], 4294967040 }
  0x28   :  { %309 = dma.done.wait [#allocation6], 576  }
  0x29   :  { %310 = vsyncadd [#allocation6], 4294966720  ;;  %v322_v0 = vmov 0.0   ;;  %v61_v1 = vld [vmem:[#allocation7 + $0x18] sm:$0xff]  ;;  %v60_v2 = vld [vmem:[#allocation7 + $0x10] sm:$0xff]  ;;  %vm86_vm0 = vcmask 130048   ;;  %v66_v7 = vlaneseq }
  0x2a   :  { %157 = vmatprep.mubr.f32.mxu0 %v322_v0  ;;  %163 = vmatprep.mubr.f32.mxu1 %v322_v0  ;;  %v59_v3 = vld [vmem:[#allocation7 + $0x8] sm:$0xff]  ;;  %v58_v4 = vld [vmem:[#allocation7] sm:$0xff]  ;;  %v57_v6 = vld [vmem:[#allocation2 + $0x8] sm:$0xff]  ;;  %s323_s0 = smov [#allocation8]  }
  0x2b   :  { %121 = vmatprep.subr.mxu0 %v61_v1  ;;  %204 = vmatprep.subr.mxu1 %v61_v1  ;;  %v56_v5 = vld [vmem:[#allocation2] sm:$0xff]  ;;  %v67_v8 = vshrl.u32 %v66_v7, 7  ;;  %v62_v10 = vld [vmem:[#allocation5] sm:$0x3]  ;;  %v63_v11 = vld [vmem:[#allocation5 + $0x2] sm:$0x3] }
  0x2c   :  { %122 = vmatpush1.msra.mxu0 %v60_v2  ;;  %206 = vmatpush1.msra.mxu1 %v60_v2  ;;  %s189_s2 = sshll.u32 %s323_s0, 4  ;;  %s190_s2 = int_to_ptr.vmem [resolvable:$true] %s189_s2 }
  0x2d   :  { %123 = vmatprep.subr.mxu0 %v59_v3  ;;  %205 = vmatprep.subr.mxu1 %v59_v3  ;;  %v68_v9 = vsub.s32 0, %v67_v8  ;;  %v72_v14 = vsub.s32 1, %v67_v8  ;;  %s287_s5 = scalar_lea.vmem %s190_s2, 256  ;;  %p292_p2 = scmp.lt.s32.totalorder %s190_s2, %s190_s2 }
  0x2e   :  { %124 = vmatpush1.msra.mxu0 %v58_v4  ;;  %207 = vmatpush1.msra.mxu1 %v58_v4  ;;  %p288_p1 = scmp.ne.s32.totalorder %s190_s2, %s287_s5  ;;  %p293_p3 = scmp.lt.s32.totalorder %s287_s5, %s287_s5 }
  0x2f   :  { %202 = vmatmul.mubr.msk.f32.vlgmr.msra.gmra.mxu0 %vm86_vm0, %v56_v5  ;;  %203 = vmatmul.mubr.msk.f32.vlgmr.msra.gmra.mxu1 %vm86_vm0, %v57_v6  ;;  %v69_v12 = vrot.slane %v62_v10, %v68_v9  ;;  %v77_v13 = vrot.slane %v63_v11, %v68_v9  ;;  %v73_v19 = vrot.slane %v62_v10, %v72_v14 }
  0x30   :  { %v81_v21 = vrot.slane %v63_v11, %v72_v14  ;;  %p294_p4 = por %p293_p3, %p292_p2 }
  0x32   :  { %p295_p5 = pnand %p294_p4, %p288_p1 }
  0xef   :  { %v159_v15 = vpop.f32.mrf.mxu0  ;;  %v165_v16 = vpop.f32.mrf.mxu1 }
  0xf0   :  { %v160_v17 = vadd.f32 %v159_v15, %v69_v12  ;;  %v166_v18 = vadd.f32 %v165_v16, %v77_v13 }
  0xf1   :  { %v161_v20 = vpop.f32.mrf.mxu0  ;;  %v167_v24 = vpop.f32.mrf.mxu1 }
  0xf2   :  { %v170_v22 = vmul.f32 0.5, %v160_v17  ;;  %v171_v23 = vmul.f32 0.5, %v166_v18  ;;  %v162_v25 = vadd.f32 %v161_v20, %v73_v19  ;;  %v168_v26 = vadd.f32 %v167_v24, %v81_v21 }
  0xf4   :  { %219 = vtanh.f32 %v170_v22 }
  0xf5   :  { %221 = vtanh.f32 %v171_v23 }
  0xf6   :  { %223 = vtanh.f32 %v162_v25 }
  0xf7   :  { %225 = vtanh.f32 %v168_v26 }
 0x101   :  { %v220_v27 = vpop.eup %219 }
 0x102   :  { %v222_v28 = vpop.eup %221  ;;  %v174_v29 = vmul.f32 0.5, %v220_v27 }
 0x103   :  { %v175_v30 = vmul.f32 0.5, %v222_v28  ;;  %v224_v32 = vpop.eup %223 }
 0x104   :  { %v176_v31 = vadd.f32 0.5, %v174_v29  ;;  %v226_v34 = vpop.eup %225 }
 0x105   :  { %v177_v33 = vadd.f32 0.5, %v175_v30 }
 0x106   :  { %v180_v35 = vmul.f32 %v224_v32, %v176_v31 }
 0x107   :  { %v181_v36 = vmul.f32 %v226_v34, %v177_v33 }
 0x108   :  { %182 = vst [vmem:[#allocation8] sm:$0xff] %v180_v35 }
 0x109   :  { %183 = vst [vmem:[#allocation8 + $0x8] sm:$0xff] %v181_v36 }
 0x10a   :  { %298 = shalt.err (!%p295_p5)
}
 0x10b   :  { %195 = dma.vmem_to_hbm [thread:$0]  %s190_s2, 256, %s365_s3, [#allocation4], %s317_s22, %s317_s22, %s318_s23  }
 0x10c   :  { %311 = dma.done.wait [#allocation4], 256  }
 0x10d   :  { %312 = vsyncadd [#allocation4], 4294967040 }
 0x10e   :  { %199 = vsyncpa [#allocation3], 1 }
 0x10f   :  { %200 = vsyncpa [#allocation6], 1 }
 0x110   :  { %201 = vsyncpa [#allocation4], 1 }

</bundles_post_ra>
